<compile_context>
chip_gen: v6e
topology: v6e:2x2x1
jax: 0.10.0
libtpu: 0.0.40
codegen_flags: <defaults>
</compile_context>

<pallas_src>
import functools

import jax
import jax.numpy as jnp
from jax import lax
from jax.experimental import pallas as pl
from jax.experimental.pallas import tpu as pltpu

K = 7          # kernel_size
PAD = 3        # padding for kernel_size == 7


def _round_up(x, m):
    return (x + m - 1) // m * m


# --------------------------------------------------------------------------
# Pass 1: streaming channel reduction -> pooled (avg, max) maps
# --------------------------------------------------------------------------
def _reduce_kernel(x_ref, p_ref, sum_acc, max_acc, *, C, CT, n_ct):
    # x_ref:   (1, CT, SP) block of x (one channel tile, one spatial tile)
    # p_ref:   (1, 2, SP)  pooled output block: row 0 = avg, row 1 = max
    # sum_acc / max_acc: (1, SP) f32 VMEM running accumulators
    c = pl.program_id(2)

    @pl.when(c == 0)
    def _init():
        sum_acc[...] = jnp.zeros(sum_acc.shape, sum_acc.dtype)
        max_acc[...] = jnp.full(max_acc.shape, -jnp.inf, max_acc.dtype)

    xb = x_ref[0].astype(jnp.float32)                      # (CT, SP)

    def _accum(xs, xm):
        sum_acc[...] += jnp.sum(xs, axis=0, keepdims=True)
        max_acc[...] = jnp.maximum(max_acc[...],
                                   jnp.max(xm, axis=0, keepdims=True))

    if C % CT == 0:
        # No ragged tail: steady-state path has no masking at all.
        _accum(xb, xb)
    else:
        # Mask only the last channel tile (its out-of-range rows are
        # undefined because x is not padded in HBM anymore).
        @pl.when(c != n_ct - 1)
        def _steady():
            _accum(xb, xb)

        @pl.when(c == n_ct - 1)
        def _tail():
            valid = (lax.broadcasted_iota(jnp.int32, (CT, 1), 0)
                     < (C - (n_ct - 1) * CT))              # (CT, 1)
            _accum(jnp.where(valid, xb, 0.0),
                   jnp.where(valid, xb, -jnp.inf))

    @pl.when(c == n_ct - 1)
    def _finalize():
        p_ref[0] = jnp.concatenate(
            [sum_acc[...] * (1.0 / C), max_acc[...]], axis=0)


# --------------------------------------------------------------------------
# Pass 2: 7x7 "same" conv over the 2 pooled maps + sigmoid (flat layout)
# --------------------------------------------------------------------------
def _conv_kernel(w_ref, p_ref, o_ref, *, W, HW, LB):
    # w_ref: (2, K*K) f32 VMEM conv weights (row 0 -> avg map, row 1 -> max map)
    # p_ref: (1, 2, HW) f32 pooled maps
    # o_ref: (1, 1, HW) output block
    wv = w_ref[...]                                        # (2, K*K)
    pm = p_ref[0]                                          # (2, HW)

    # Zero-extended flat buffers: valid data in [0, HW), zeros in [HW, LB).
    # LB >= HW + PAD*(W+1), so every circular shift below wraps into zeros
    # exactly where a conv tap would read an out-of-range image row.
    buf = jnp.concatenate(
        [pm, jnp.zeros((2, LB - HW), jnp.float32)], axis=1)   # (2, LB)

    col = lax.broadcasted_iota(jnp.int32, (1, LB), 1) % W

    acc = jnp.zeros((2, LB), jnp.float32)
    for kw in range(K):
        off = kw - PAD
        # Columns whose (j + kw - PAD) tap falls outside [0, W) are zeroed.
        b = col + off
        maskf = ((b >= 0) & (b < W)).astype(jnp.float32)       # (1, LB)
        inner = jnp.zeros((2, LB), jnp.float32)
        for kh in range(K):
            s = (kh - PAD) * W + off                           # flat tap offset
            sh = (-s) % LB                                     # jnp.roll shift
            rolled = buf if sh == 0 else pltpu.roll(buf, shift=sh, axis=1)
            wcol = wv[:, kh * K + kw: kh * K + kw + 1]         # (2, 1) static
            inner = inner + wcol * rolled                      # one roll, 2 maps
        acc = acc + maskf * inner

    # Single row-sum + single slice at the very end (no per-tap slices).
    y = jnp.sum(acc, axis=0, keepdims=True)                    # (1, LB)
    o_ref[0] = jax.nn.sigmoid(y[:, :HW]).astype(o_ref.dtype)


# --------------------------------------------------------------------------
# Wrapper
# --------------------------------------------------------------------------
def spatial_attention(x, w):
    """x: (N, C, H, W); w: (1, 2, K, K) (PyTorch OIHW conv weight, no bias)."""
    N, C, H, W_ = x.shape
    HW = H * W_
    LB = _round_up(HW + PAD * (W_ + 1), 128)

    # Free reshape (contiguous) -- no padding pass over x in HBM.
    x_flat = x.reshape(N, C, HW)

    # Spatial parallel split so both v7x TensorCores work even when N == 1.
    if N == 1 and HW % 256 == 0:
        n_sp, SP = 2, HW // 2
    else:
        n_sp, SP = 1, HW

    # Channel-tile from a ~4 MiB per-block budget (>=85% of HBM roofline),
    # rounded to the dtype's sublane packing.
    itemsize = x.dtype.itemsize
    sub = {4: 8, 2: 16, 1: 32}.get(itemsize, 8)
    block_bytes = 4 * 1024 * 1024
    rows = max(sub, (block_bytes // max(1, SP * itemsize)) // sub * sub)
    if C <= rows:
        CT, n_ct = C, 1
    else:
        CT = rows
        n_ct = pl.cdiv(C, CT)

    reduce_kernel = functools.partial(_reduce_kernel, C=C, CT=CT, n_ct=n_ct)
    pooled = pl.pallas_call(
        reduce_kernel,
        out_shape=jax.ShapeDtypeStruct((N, 2, HW), jnp.float32),
        grid_spec=pltpu.PrefetchScalarGridSpec(
            num_scalar_prefetch=0,
            grid=(N, n_sp, n_ct),
            in_specs=[pl.BlockSpec((1, CT, SP), lambda n, s, c: (n, c, s))],
            out_specs=pl.BlockSpec((1, 2, SP), lambda n, s, c: (n, 0, s)),
            scratch_shapes=[pltpu.VMEM((1, SP), jnp.float32),   # sum acc
                            pltpu.VMEM((1, SP), jnp.float32)],  # max acc
        ),
        compiler_params=pltpu.CompilerParams(
            dimension_semantics=("parallel", "parallel", "arbitrary"),
            vmem_limit_bytes=48 * 1024 * 1024,
        ),
        cost_estimate=pl.CostEstimate(
            flops=int(2 * N * C * HW),
            transcendentals=0,
            bytes_accessed=int(x.size * itemsize + N * 2 * HW * 4),
        ),
    )(x_flat)

    w2 = w.reshape(2, K * K).astype(jnp.float32)
    conv_kernel = functools.partial(_conv_kernel, W=W_, HW=HW, LB=LB)
    out_flat = pl.pallas_call(
        conv_kernel,
        out_shape=jax.ShapeDtypeStruct((N, 1, HW), x.dtype),
        grid_spec=pltpu.PrefetchScalarGridSpec(
            num_scalar_prefetch=0,
            grid=(N,),
            in_specs=[pl.BlockSpec((2, K * K), lambda n: (0, 0)),
                      pl.BlockSpec((1, 2, HW), lambda n: (n, 0, 0))],
            out_specs=pl.BlockSpec((1, 1, HW), lambda n: (n, 0, 0)),
        ),
        compiler_params=pltpu.CompilerParams(
            dimension_semantics=("parallel",),
        ),
        cost_estimate=pl.CostEstimate(
            flops=int(2 * N * 2 * K * K * HW),
            transcendentals=int(N * HW),
            bytes_accessed=int(N * 2 * HW * 4 + N * HW * itemsize
                               + 2 * K * K * 4),
        ),
    )(w2, pooled)

    return out_flat.reshape(N, 1, H, W_)


def reference(x, w):
    avg = jnp.mean(x, axis=1, keepdims=True)
    mx = jnp.max(x, axis=1, keepdims=True)
    cat = jnp.concatenate([avg, mx], axis=1)
    y = lax.conv_general_dilated(
        cat, w, window_strides=(1, 1),
        padding=((PAD, PAD), (PAD, PAD)),
        dimension_numbers=("NCHW", "OIHW", "NCHW"))
    return jax.nn.sigmoid(y)


if __name__ == "__main__":
    key = jax.random.PRNGKey(0)
    kx, kw = jax.random.split(key)

    N, C, H, W_ = 2, 4, 16, 16
    x = jax.random.normal(kx, (N, C, H, W_), dtype=jnp.float32)
    # Deterministic synthetic conv weight (PyTorch shape: (1, 2, 7, 7), no bias).
    w = 0.1 * jax.random.normal(kw, (1, 2, K, K), dtype=jnp.float32)

    out = jax.block_until_ready(spatial_attention(x, w))
    ref = jax.block_until_ready(reference(x, w))

    assert out.shape == (N, 1, H, W_)
    assert jnp.allclose(out, ref, atol=1e-5, rtol=1e-5), "mismatch vs reference"

    print("KERNEL_OK")
</pallas_src>

<mosaic_0001>
module attributes {stable_mosaic.version = 11 : i64} {
  func.func @_reduce_kernel(%arg0: i32, %arg1: i32, %arg2: i32, %arg3: memref<1x4x256xf32, #tpu.memory_space<vmem>>, %arg4: memref<1x2x256xf32, #tpu.memory_space<vmem>>, %arg5: memref<1x256xf32, #tpu.memory_space<vmem>>, %arg6: memref<1x256xf32, #tpu.memory_space<vmem>>) attributes {dimension_semantics = [#tpu.dimension_semantics<parallel>, #tpu.dimension_semantics<parallel>, #tpu.dimension_semantics<arbitrary>], iteration_bounds = array<i64: 2, 1, 1>, scalar_prefetch = 0 : i64, scratch_operands = 2 : i64, tpu.core_type = #tpu.core_type<tc>, window_params = [{transform_indices = @transform_0, window_bounds = array<i64: 1, 4, 256>}, {transform_indices = @transform_1, window_bounds = array<i64: 1, 2, 256>}]} {
    %c0_i32 = arith.constant 0 : i32
    %0 = arith.cmpi eq, %arg2, %c0_i32 : i32
    %1 = arith.extui %0 : i1 to i32
    %c0_i32_0 = arith.constant 0 : i32
    %2 = arith.cmpi ne, %1, %c0_i32_0 : i32
    scf.if %2 {
      %cst_14 = arith.constant 0.000000e+00 : f32
      %18 = vector.broadcast %cst_14 : f32 to vector<1x256xf32>
      %c0_15 = arith.constant 0 : index
      %c0_16 = arith.constant 0 : index
      %19 = vector.load %arg5[%c0_15, %c0_16] : memref<1x256xf32, #tpu.memory_space<vmem>>, vector<1x256xf32>
      tpu.vector_store %arg5[%c0_15, %c0_16], %18 {strides = array<i32>} : memref<1x256xf32, #tpu.memory_space<vmem>>, vector<1x256xf32>,
      %cst_17 = arith.constant 0xFF800000 : f32
      %20 = vector.broadcast %cst_17 : f32 to vector<1x256xf32>
      %c0_18 = arith.constant 0 : index
      %c0_19 = arith.constant 0 : index
      %21 = vector.load %arg6[%c0_18, %c0_19] : memref<1x256xf32, #tpu.memory_space<vmem>>, vector<1x256xf32>
      tpu.vector_store %arg6[%c0_18, %c0_19], %20 {strides = array<i32>} : memref<1x256xf32, #tpu.memory_space<vmem>>, vector<1x256xf32>,
    } else {
    }
    %c0 = arith.constant 0 : index
    %c0_1 = arith.constant 0 : index
    %c0_2 = arith.constant 0 : index
    %3 = vector.load %arg3[%c0, %c0_1, %c0_2] : memref<1x4x256xf32, #tpu.memory_space<vmem>>, vector<1x4x256xf32>
    %4 = vector.shape_cast %3 : vector<1x4x256xf32> to vector<4x256xf32>
    %c0_3 = arith.constant 0 : index
    %c0_4 = arith.constant 0 : index
    %5 = vector.load %arg5[%c0_3, %c0_4] : memref<1x256xf32, #tpu.memory_space<vmem>>, vector<1x256xf32>
    %cst = arith.constant dense<0.000000e+00> : vector<256xf32>
    %6 = vector.multi_reduction <add>, %4, %cst [0] : vector<4x256xf32> to vector<256xf32>
    %7 = vector.shape_cast %6 : vector<256xf32> to vector<1x256xf32>
    %8 = arith.addf %5, %7 : vector<1x256xf32>
    %c0_5 = arith.constant 0 : index
    %c0_6 = arith.constant 0 : index
    %9 = vector.load %arg5[%c0_5, %c0_6] : memref<1x256xf32, #tpu.memory_space<vmem>>, vector<1x256xf32>
    tpu.vector_store %arg5[%c0_5, %c0_6], %8 {strides = array<i32>} : memref<1x256xf32, #tpu.memory_space<vmem>>, vector<1x256xf32>,
    %c0_7 = arith.constant 0 : index
    %c0_8 = arith.constant 0 : index
    %10 = vector.load %arg6[%c0_7, %c0_8] : memref<1x256xf32, #tpu.memory_space<vmem>>, vector<1x256xf32>
    %cst_9 = arith.constant dense<0xFF800000> : vector<256xf32>
    %11 = vector.multi_reduction <maximumf>, %4, %cst_9 [0] : vector<4x256xf32> to vector<256xf32>
    %12 = vector.shape_cast %11 : vector<256xf32> to vector<1x256xf32>
    %13 = arith.maximumf %10, %12 : vector<1x256xf32>
    %c0_10 = arith.constant 0 : index
    %c0_11 = arith.constant 0 : index
    %14 = vector.load %arg6[%c0_10, %c0_11] : memref<1x256xf32, #tpu.memory_space<vmem>>, vector<1x256xf32>
    tpu.vector_store %arg6[%c0_10, %c0_11], %13 {strides = array<i32>} : memref<1x256xf32, #tpu.memory_space<vmem>>, vector<1x256xf32>,
    %c0_i32_12 = arith.constant 0 : i32
    %15 = arith.cmpi eq, %arg2, %c0_i32_12 : i32
    %16 = arith.extui %15 : i1 to i32
    %c0_i32_13 = arith.constant 0 : i32
    %17 = arith.cmpi ne, %16, %c0_i32_13 : i32
    scf.if %17 {
      %c0_14 = arith.constant 0 : index
      %c0_15 = arith.constant 0 : index
      %18 = vector.load %arg5[%c0_14, %c0_15] : memref<1x256xf32, #tpu.memory_space<vmem>>, vector<1x256xf32>
      %cst_16 = arith.constant 2.500000e-01 : f32
      %19 = vector.broadcast %cst_16 : f32 to vector<1x256xf32>
      %20 = arith.mulf %18, %19 : vector<1x256xf32>
      %c0_17 = arith.constant 0 : index
      %c0_18 = arith.constant 0 : index
      %21 = vector.load %arg6[%c0_17, %c0_18] : memref<1x256xf32, #tpu.memory_space<vmem>>, vector<1x256xf32>
      %22 = tpu.concatenate %20, %21 in 0 : vector<1x256xf32>, vector<1x256xf32> -> vector<2x256xf32>
      %c0_19 = arith.constant 0 : index
      %c0_20 = arith.constant 0 : index
      %c0_21 = arith.constant 0 : index
      %23 = vector.load %arg4[%c0_19, %c0_20, %c0_21] : memref<1x2x256xf32, #tpu.memory_space<vmem>>, vector<1x2x256xf32>
      %24 = vector.shape_cast %23 : vector<1x2x256xf32> to vector<2x256xf32>
      %25 = vector.shape_cast %22 : vector<2x256xf32> to vector<1x2x256xf32>
      tpu.vector_store %arg4[%c0_19, %c0_20, %c0_21], %25 {strides = array<i32>} : memref<1x2x256xf32, #tpu.memory_space<vmem>>, vector<1x2x256xf32>,
    } else {
    }
    return
  }
  func.func @transform_0(%arg0: i32, %arg1: i32, %arg2: i32) -> (i32, i32, i32) {
    %c0_i32 = arith.constant 0 : i32
    return %arg0, %arg2, %arg1 : i32, i32, i32
  }
  func.func @transform_1(%arg0: i32, %arg1: i32, %arg2: i32) -> (i32, i32, i32) {
    %c0_i32 = arith.constant 0 : i32
    %c0_i32_0 = arith.constant 0 : i32
    return %arg0, %c0_i32, %arg1 : i32, i32, i32
  }
}

</mosaic_0001>

<bundles_post_ra>
// kernel: tpu_custom_call.1
= control target key start
LH: loop header
LB: loop body
LE: loop exit
PB: predicated region body
PF: predicated region fallthrough
CT: control target
= control target key end

     0   :  { %6 = vsyncpa [#allocation5], 0  ;;  %s758_s0 = inlined_call_operand.hbm [shape: f32[2,4,256], index: 0, kind: input, shape index: {}]   ;;  %s759_s1 = inlined_call_operand.hbm [shape: f32[2,2,256], index: 1, kind: output, shape index: {}]  }
   0x1   :  { %8 = vsyncpa [#allocation5 + $0x1], 0 }
   0x2   :  { %9 = vsyncpa [#allocation6], 0 }
   0x3   :  { %11 = vsyncpa [#allocation6 + $0x1], 0  ;;  %s611_s6 = smov 0   ;;  %s613_s7 = smov 0  }
   0x4   :  { %s615_s8 = smov 0   ;;  %s617_s9 = smov 0  }
   0x5   :  { %s619_s10 = smov 0   ;;  %s621_s11 = smov 0  }
   0x6 LB: > { %s402_s12 = sadd.s32 4294967295, %s594_s11   ;;  %s403_s13 = sadd.s32 4294967294, %s594_s11   ;;  %s594_s11 = sphi %s621_s11, %s17_s11   ;;  %s590_s10 = sphi %s619_s10, %s773_s10   ;;  %s586_s9 = sphi %s617_s9, %s772_s9   ;;  %s582_s8 = sphi %s615_s8, %s771_s8   ;;  %s578_s7 = sphi %s613_s7, %s770_s7   ;;  %s574_s6 = sphi %s611_s6, %s769_s6  }
   0x7   : > { %s36_s14 = sadd.s32 1, %s590_s10  ;;  %s47_s15 = sadd.s32 1, %s582_s8 }
   0x8   : > { %p38_p0 = scmp.ge.s32.totalorder %s36_s14, 2  ;;  %p54_p1 = scmp.ne.s32.totalorder %s582_s8, %s578_s7 }
   0x9   : > { %p55_p2 = scmp.eq.s32.totalorder %s594_s11, 0  ;;  %p60_p3 = scmp.ne.s32.totalorder %s578_s7, %s574_s6 }
   0xa   : > { %s775_s14 = smov (%p38_p0, %s36_s14), 0  ;;  %p61_p5 = scmp.eq.s32.totalorder %s402_s12, 0 }
   0xb   : > { %p652_p4 = por %p55_p2, %p54_p1  ;;  %s40_s17 = ssub.s32 %s590_s10, %s775_s14 }
   0xc   : > { %p86_p6 = scmp.eq.s32.totalorder %s402_s12, 1  ;;  %p45_p7 = scmp.eq.s32.totalorder %s40_s17, 0 }
   0xd   : > { %p658_p8 = por %p61_p5, %p60_p3  ;;  %p92_p10 = scmp.eq.s32.totalorder %s403_s13, 1 }
   0xe   : > { %p662_p9 = por %p86_p6, %p54_p1  ;;  %p432_p13 = scmp.lt.s32.totalorder %s594_s11, 2 }
   0xf   : > { %s667_s20 = scalar_select %p45_p7, %s582_s8, %s47_s15  }
  0x10   : > { %p669_p11 = por %p92_p10, %p60_p3  ;;  %s112_s22 = sand.u32 1, %s582_s8  }
  0x11   : > { %s406_s23 = sshll.u32 %s112_s22, 3  ;;  %s418_s24 = sshll.u32 %s590_s10, 7 }
  0x12   : > { %s763_s21 = scalar_select %p669_p11, 1, 0 }
  0x13   : > { %s126_s27 = scalar_lea.hbm %s758_s0, %s418_s24  ;;  %s116_s28 = scalar_lea.vmem [#allocation4], %s406_s23 }
  0x14   : > { %s128_s29 = sshll.u32 %s116_s28, 4  ;;  %p682_p0 = pnand %p432_p13, %p652_p4  ;;  %s129_s29 = int_to_ptr.vmem [resolvable:$true] %s128_s29 }
  0x15   : > { %p409_p1 = scmp.ge.s32.totalorder %s594_s11, 1  ;;  %p133_p2 = scmp.lt.s32.totalorder %s594_s11, 3 }
  0x16   : > { %s113_s2 = scalar_lea.sflag [#allocation5], %s112_s22  ;;  %p488_p3 = pneg %p682_p0 }
  0x17   : > { %s499_s3 = scalar_lea.vmem %s129_s29, 128  ;;  %s596_s4 = smov [#allocation4]  }
  0x18   : > { %p500_p5 = scmp.ne.s32.totalorder %s129_s29, %s499_s3  ;;  %s504_s5 = sshll.u32 %s596_s4, 4  ;;  %s505_s5 = int_to_ptr.vmem [resolvable:$false] %s504_s5 }
  0x19   : > { %s506_s12 = scalar_lea.vmem %s505_s5, 256  ;;  %p507_p10 = scmp.lt.s32.totalorder %s129_s29, %s505_s5 }
  0x1a   : > { %p502_p6 = pnand %p500_p5, %p488_p3  ;;  %p508_p12 = scmp.lt.s32.totalorder %s506_s12, %s499_s3 }
  0x1c   : > { %p503_p7 = pneg %p502_p6  ;;  %p509_p4 = por %p508_p12, %p507_p10 }
  0x1e   : > { %p510_p13 = pnand %p509_p4, %p503_p7 }
  0x20   : > { %513 = shalt.err (!%p510_p13)
}
  0x21   : > { %427 = dma.hbm_to_vmem [thread:$0]  (!%p682_p0), %s126_s27, 128, %s129_s29, %s113_s2  }
  0x22   : > { %p134_p11 = pnand %p409_p1, %p133_p2 }
  0x23   : > { %s697_s13 = sand.u32 (!%p134_p11), 1, %s578_s7  }
  0x24   : > { %137 = sbr.rel (%p134_p11) target bundleno = 94 (0x5e), region = 24  ;;  %s410_s15 = sshll.u32 (!%p134_p11), %s697_s13, 3 }
  0x25   : > { %s140_s16 = scalar_lea.sflag (!%p134_p11), [#allocation5], %s697_s13  ;;  %s143_s17 = scalar_lea.vmem (!%p134_p11), [#allocation4], %s410_s15 }
  0x29   : > { %565 = dma.done.wait (%p658_p8), %s140_s16, 128  }
  0x2a   : > { %567 = vsyncadd (%p658_p8), %s140_s16, 4294967168  ;;  %v168_v0 = vlaneseq  ;;  %v597_v2 = vmov 0.0   ;;  %v598_v3 = vmov -inf   ;;  %vm179_vm1 = vcmask 1043456   ;;  %v174_v4 = vld [vmem:[%s143_s17] sm:$0xff]  ;;  %s411_s18 = sshll.u32 %s697_s13, 2 }
  0x2b   : > { %v177_v5 = vcombine.high %v174_v4, %v174_v4  ;;  %v180_v6 = vsel %vm179_vm1, %v174_v4, 0.0  ;;  %v219_v7 = vsel %vm179_vm1, %v174_v4, -inf  ;;  %v599_v16 = vmov 1966171168   ;;  %s161_s22 = scalar_lea.vmem [#allocation7], %s411_s18  ;;  %s419_s24 = sshll.u32 %s586_s9, 6 }
  0x2c   : > { %vm705_vm0 = vcmp.lt.s32.totalorder %v168_v0, 256  ;;  %v181_v8 = vrot.slane %v180_v6, 4  ;;  %v220_v9 = vrot.slane %v219_v7, 4  ;;  %v198_v17 = vunpack.c.l.s4 %v599_v16  ;;  %s313_s23 = sshll.u32 %s161_s22, 4  ;;  %s311_s27 = scalar_lea.hbm %s759_s1, %s419_s24  ;;  %s314_s23 = int_to_ptr.vmem [resolvable:$true] %s313_s23 }
  0x2d   : > { %172 = vst.msk [vmem:[#allocation2] sm:$0x3] %vm705_vm0, %v597_v2  ;;  %173 = vst.msk [vmem:[#allocation3] sm:$0x3] %vm705_vm0, %v598_v3  ;;  %v187_v10 = vsel %vm179_vm1, %v177_v5, 0.0  ;;  %v226_v11 = vsel %vm179_vm1, %v177_v5, -inf }
  0x2e   : > { %v182_v12 = vadd.f32 %v181_v8, %v180_v6  ;;  %v188_v13 = vrot.slane %v187_v10, 4  ;;  %v221_v14 = vmax.f32 %v219_v7, %v220_v9  ;;  %v227_v15 = vrot.slane %v226_v11, 4  ;;  %s297_s28 = scalar_lea.sflag [#allocation6], %s697_s13  ;;  %s514_s29 = scalar_lea.vmem %s314_s23, 64 }
  0x2f   : > { %v199_v26 = vunpack.c.0.s8 %v198_v17  ;;  %v201_v27 = vshrl.u32 %v168_v0, 7  ;;  %vm281_vm2 = vcmask 1040384   ;;  %p515_p8 = scmp.ne.s32.totalorder %s314_s23, %s514_s29  ;;  %s600_s30 = smov [#allocation7]  }
  0x30   : > { %v183_v18 = vrot.slane %v182_v12, 2  ;;  %v189_v19 = vadd.f32 %v188_v13, %v187_v10  ;;  %v222_v20 = vrot.slane %v221_v14, 2  ;;  %v228_v21 = vmax.f32 %v226_v11, %v227_v15  ;;  %s518_s2 = sshll.u32 %s600_s30, 4  ;;  %s519_s2 = int_to_ptr.vmem [resolvable:$false] %s518_s2 }
  0x31   : > { %v202_v36 = vsub.s32 %v199_v26, %v201_v27  ;;  %v262_v49 = vsub.s32 0, %v201_v27  ;;  %v266_v50 = vsub.s32 1, %v201_v27  ;;  %p516_p11 = pnand %p515_p8, %p662_p9  ;;  %s520_s3 = scalar_lea.vmem %s519_s2, 128 }
  0x32   : > { %v184_v22 = vadd.f32 %v183_v18, %v182_v12  ;;  %v190_v23 = vrot.slane %v189_v19, 2  ;;  %v223_v24 = vmax.f32 %v221_v14, %v222_v20  ;;  %v229_v25 = vrot.slane %v228_v21, 2  ;;  %p521_p0 = scmp.lt.s32.totalorder %s314_s23, %s519_s2  ;;  %p522_p1 = scmp.lt.s32.totalorder %s520_s3, %s514_s29 }
  0x33   : > { %p517_p12 = pneg %p516_p11 }
  0x34   : > { %v185_v28 = vrot.slane %v184_v22, 1  ;;  %v191_v29 = vadd.f32 %v190_v23, %v189_v19  ;;  %v224_v30 = vrot.slane %v223_v24, 1  ;;  %v230_v31 = vmax.f32 %v228_v21, %v229_v25  ;;  %v175_v43 = vld [vmem:[#allocation2] sm:$0x3]  ;;  %v218_v44 = vld [vmem:[#allocation3] sm:$0x3]  ;;  %p523_p2 = por %p522_p1, %p521_p0 }
  0x36   : > { %v186_v32 = vadd.f32 %v185_v28, %v184_v22  ;;  %v192_v33 = vrot.slane %v191_v29, 1  ;;  %v225_v34 = vmax.f32 %v223_v24, %v224_v30  ;;  %v231_v35 = vrot.slane %v230_v31, 1  ;;  %p524_p3 = pnand %p523_p2, %p517_p12 }
  0x38   : > { %v193_v37 = vadd.f32 %v192_v33, %v191_v29  ;;  %v232_v38 = vmax.f32 %v230_v31, %v231_v35 }
  0x3a   : > { %v196_v39 = vcombine.low %v186_v32, %v193_v37  ;;  %v235_v40 = vcombine.low %v225_v34, %v232_v38 }
  0x3c   : > { %v203_v41 = vrot.slane %v196_v39, %v202_v36  ;;  %v242_v42 = vrot.slane %v235_v40, %v202_v36 }
  0x3e   : > { %v210_v45 = vrot.slane %v203_v41, %v202_v36  ;;  %v249_v46 = vrot.slane %v242_v42, %v202_v36 }
  0x40   : > { %v212_v47 = vadd.f32 %v210_v45, %v175_v43  ;;  %v251_v48 = vmax.f32 %v218_v44, %v249_v46 }
  0x42   : > { %217 = vst.msk [vmem:[#allocation2] sm:$0x3] %vm705_vm0, %v212_v47  ;;  %252 = vst.msk [vmem:[#allocation3] sm:$0x3] %vm705_vm0, %v251_v48 }
  0x49   : > { %v256_v51 = vld [vmem:[#allocation2] sm:$0x3]  ;;  %v258_v52 = vld [vmem:[#allocation3] sm:$0x3] }
  0x4a   : > { %v257_v53 = vmul.f32 0.25, %v256_v51  ;;  %v274_v54 = vrot.slane %v258_v52, %v262_v49  ;;  %v278_v55 = vrot.slane %v258_v52, %v266_v50 }
  0x4c   : > { %v263_v56 = vrot.slane %v257_v53, %v262_v49  ;;  %v267_v57 = vrot.slane %v257_v53, %v266_v50 }
  0x4e   : > { %v282_v58 = vsel %vm281_vm2, %v263_v56, %v274_v54  ;;  %v283_v59 = vsel %vm281_vm2, %v267_v57, %v278_v55 }
  0x4f   : > { %v286_v60 = vcombine.low %v282_v58, %v283_v59 }
  0x51   : > { %412 = vst.sshfl [vmem:[%s161_s22] sm:$0x33 pattern:$0x76325410] %v286_v60 }
  0x52   : > { %527 = shalt.err (!%p524_p3)
}
  0x53   : > { %s528_s9 = scalar_lea.hbm %s311_s27, 64  ;;  %s532_s12 = scalar_lea.hbm %s759_s1, 128 }
  0x54   : > { %p529_p5 = scmp.ne.s32.totalorder %s311_s27, %s528_s9  ;;  %p533_p10 = scmp.lt.s32.totalorder %s311_s27, %s759_s1 }
  0x55   : > { %p534_p4 = scmp.lt.s32.totalorder %s532_s12, %s528_s9 }
  0x56   : > { %p530_p6 = pnand %p529_p5, %p662_p9 }
  0x57   : > { %p535_p13 = por %p534_p4, %p533_p10 }
  0x58   : > { %p531_p7 = pneg %p530_p6 }
  0x5a   : > { %p536_p8 = pnand %p535_p13, %p531_p7 }
  0x5c   : > { %539 = shalt.err (!%p536_p8)
}
  0x5d   : > { %422 = dma.vmem_to_hbm [thread:$0]  (%p662_p9), %s314_s23, 64, %s311_s27, %s297_s28  }
  0x5e PF: > { %s325_s16 = sand.u32 1, %s574_s6   ;;  %p767_p11 = scmp.ne.s32.totalorder %s763_s21, 0 }
  0x5f   : > { %p768_p12 = scmp.ge.s32.totalorder %s594_s11, 2  ;;  %s326_s17 = scalar_lea.sflag [#allocation6], %s325_s16 }
  0x61   : > { %p429_p0 = pnand %p768_p12, %p767_p11 }
  0x63   : > { %p430_p1 = pneg %p429_p0 }
  0x65   : > { %569 = dma.done.wait (%p430_p1), %s326_s17, 64  }
  0x66   : > { %571 = vsyncadd (%p430_p1), %s326_s17, 4294967232  ;;  %s17_s11 = sadd.s32 1, %s594_s11   ;;  %s769_s6 = smov %s578_s7 }
  0x67   : > { %p14_p2 = scmp.ge.s32.totalorder %s17_s11, 4   ;;  %s770_s7 = smov %s582_s8 }
  0x68   : > { %s771_s8 = smov %s667_s20  ;;  %s772_s9 = smov %s590_s10 }
  0x69   : > { %s773_s10 = smov %s775_s14  ;;  %16 = sbr.rel (!%p14_p2) target bundleno = 6 (0x6), region = 77 }
  0x6e   :  { %331 = vsyncpa [#allocation5], 1 }
  0x6f   :  { %333 = vsyncpa [#allocation5 + $0x1], 1 }
  0x70   :  { %334 = vsyncpa [#allocation6], 1 }
  0x71   :  { %336 = vsyncpa [#allocation6 + $0x1], 1 }

</bundles_post_ra>
